<compile_context>
chip_gen: v6e
topology: v6e:2x2x1
jax: 0.10.0
libtpu: 0.0.40
codegen_flags: <defaults>
</compile_context>

<pallas_src>
import math

import jax
import jax.numpy as jnp
from jax import lax
from jax.experimental import pallas as pl
from jax.experimental.pallas import tpu as pltpu


def _make_attention_kernel(num_heads, head_dim, seq_len, batch_per_block,
                           kv_tile, scale, exp_dtype):
    inner_dim = num_heads * head_dim
    num_kv_tiles = seq_len // kv_tile  # wrapper guarantees divisibility

    def kernel(x_ref, wqkv_ref, bqkv_ref, wout_ref, bout_ref, o_ref,
               qkv_scratch, heads_scratch):
        # ---- fused QKV projection (MXU, bf16 operands, f32 accumulate) ----
        qkv = jnp.dot(x_ref[...], wqkv_ref[...],
                      preferred_element_type=jnp.float32) + bqkv_ref[0]
        # Fold the softmax scale into q ONCE per block (removes the per-KV-tile
        # (N x kv_tile) VPU multiply), then park QKV in a bf16 VMEM scratch so
        # later head / KV-tile slices are plain vlds, not slices of a giant
        # live f32 value.
        qkv_scratch[:, :inner_dim] = (qkv[:, :inner_dim] * scale).astype(jnp.bfloat16)
        qkv_scratch[:, inner_dim:] = qkv[:, inner_dim:].astype(jnp.bfloat16)

        def batch_body(b, carry):
            if isinstance(b, int):                       # static specialization
                row0 = b * seq_len
            else:
                row0 = pl.multiple_of(b * seq_len, seq_len)
            rows = pl.ds(row0, seq_len)

            # Static head loop: keeps head column offsets static (no dynamic
            # lane slicing); the fori_loop over KV tiles below bounds the live
            # set per head.
            for h in range(num_heads):
                c0 = h * head_dim

                q = qkv_scratch[rows, c0:c0 + head_dim]  # (N, hd) bf16, pre-scaled

                def kv_body(t, carry):
                    m_i, l_i, acc = carry
                    r = row0 + t * kv_tile
                    if not isinstance(r, int):
                        r = pl.multiple_of(r, kv_tile)
                    kv_rows = pl.ds(r, kv_tile)
                    k_t = qkv_scratch[kv_rows,
                                      inner_dim + c0:inner_dim + c0 + head_dim]
                    v_t = qkv_scratch[kv_rows,
                                      2 * inner_dim + c0:2 * inner_dim + c0 + head_dim]

                    # q @ k_t.T without an explicit transpose (MXU handles it)
                    s = lax.dot_general(
                        q, k_t,
                        dimension_numbers=(((1,), (1,)), ((), ())),
                        preferred_element_type=jnp.float32)      # (N, Tk) f32

                    m_new = jnp.maximum(m_i, jnp.max(s, axis=-1, keepdims=True))
                    alpha = jnp.exp(m_i - m_new)                  # (N,1) f32, tiny
                    # exp in bf16 on v6e/v7x (EUP relief), f32 on v5e/older.
                    p = jnp.exp((s - m_new).astype(exp_dtype))
                    l_i = alpha * l_i + jnp.sum(p.astype(jnp.float32),
                                                axis=-1, keepdims=True)
                    acc = alpha * acc + jnp.dot(p.astype(jnp.bfloat16), v_t,
                                                preferred_element_type=jnp.float32)
                    return m_new, l_i, acc

                init = (jnp.full((seq_len, 1), -jnp.inf, jnp.float32),
                        jnp.zeros((seq_len, 1), jnp.float32),
                        jnp.zeros((seq_len, head_dim), jnp.float32))
                if num_kv_tiles == 1:
                    m_i, l_i, acc = kv_body(0, init)
                else:
                    m_i, l_i, acc = lax.fori_loop(0, num_kv_tiles, kv_body, init)

                out_h = acc * pl.reciprocal(l_i, approx=True)     # (N, hd) f32
                heads_scratch[rows, c0:c0 + head_dim] = out_h.astype(jnp.bfloat16)
            return carry

        if batch_per_block == 1:
            batch_body(0, 0)
        else:
            lax.fori_loop(0, batch_per_block, batch_body, 0)

        # ---- ONE full-K output projection over the whole M-tile ----
        y = jnp.dot(heads_scratch[...], wout_ref[...],
                    preferred_element_type=jnp.float32) + bout_ref[0]
        # Dropout(p=0.1) is the identity in eval mode.
        o_ref[...] = y.astype(o_ref.dtype)

    return kernel


def attention_forward(x, w_qkv, b_qkv, w_out, b_out, *, num_heads, head_dim,
                      batch_per_block=None, kv_tile=None, out_dtype=None):
    """x: (B, N, D) float32.  Returns (B, N, D) in `out_dtype` (default f32)."""
    B, N, D = x.shape
    inner_dim = num_heads * head_dim
    scale = head_dim ** (-0.5)
    out_dtype = jnp.float32 if out_dtype is None else out_dtype

    # ---- generation-aware knobs ----
    try:
        vmem_cap = int(pltpu.get_tpu_info().vmem_capacity_bytes)
    except Exception:
        vmem_cap = 64 << 20            # conservative (v7x per-TC VMEM)
    try:
        kind = jax.devices()[0].device_kind.lower()
    except Exception:
        kind = ""
    # bf16 EUP path exists on v6e/v7x; keep f32 exp on v5e/v5p/v4 and older.
    exp_dtype = (jnp.float32
                 if any(s in kind for s in ("v2", "v3", "v4", "v5"))
                 else jnp.bfloat16)

    # ---- M-tile heuristic: keep >= ~8 grid steps when B allows (DMA overlap,
    #      v7x 2-TC sharding), M-tile <= ~1024 rows ----
    if batch_per_block is None:
        bpb = max(1, 1024 // max(N, 1))
        bpb = min(bpb, max(1, B // 8))
        bpb = max(1, min(bpb, B))
        while B % bpb:
            bpb -= 1
        batch_per_block = bpb
    # (8,128) layout rule: with >1 grid step the M-tile must be sublane aligned;
    # fall back to a single full-array block otherwise (exempt from the rule).
    if (batch_per_block * N) % 8 != 0:
        batch_per_block = B
    assert B % batch_per_block == 0

    # ---- KV tile: divisor of N, preferring multiples of 128 (lane width) ----
    if kv_tile is None:
        kv_tile = N
        if N > 512:
            best = None
            for cand in range(min(512, N), 0, -1):
                if N % cand == 0:
                    if cand % 128 == 0:
                        best = cand
                        break
                    if best is None:
                        best = cand
            kv_tile = best
    assert N % kv_tile == 0

    # bf16 matmul operands (f32 accumulation in-kernel); biases stay f32.
    x2 = x.reshape(B * N, D).astype(jnp.bfloat16)
    w_qkv16 = w_qkv.astype(jnp.bfloat16)
    w_out16 = w_out.astype(jnp.bfloat16)
    b_qkv2 = b_qkv.reshape(1, 3 * inner_dim).astype(jnp.float32)
    b_out2 = b_out.reshape(1, D).astype(jnp.float32)

    m_block = batch_per_block * N
    grid = (B // batch_per_block,)

    kernel = _make_attention_kernel(num_heads, head_dim, N, batch_per_block,
                                    kv_tile, scale, exp_dtype)

    out_bytes = jnp.dtype(out_dtype).itemsize
    # VMEM budget: double-buffered x/out blocks, single-copy resident weights,
    # QKV + heads scratches, and the live per-head score/acc tiles.
    est = (2 * m_block * D * 2                     # x block, bf16, double-buffered
           + 2 * m_block * D * out_bytes           # out block, double-buffered
           + D * 3 * inner_dim * 2                 # w_qkv, resident bf16
           + 3 * inner_dim * 4                     # b_qkv
           + inner_dim * D * 2                     # w_out, resident bf16
           + D * 4                                 # b_out
           + m_block * 3 * inner_dim * 2           # QKV scratch, bf16
           + m_block * inner_dim * 2               # heads scratch, bf16
           + N * kv_tile * 4                       # live score tile, f32
           + 2 * N * head_dim * 4)                 # acc + misc, f32
    vmem_cap_limit = min(100 << 20, max(32 << 20, vmem_cap - (16 << 20)))
    vmem_limit = int(min(max(2 * est, 8 << 20), vmem_cap_limit))

    out = pl.pallas_call(
        kernel,
        out_shape=jax.ShapeDtypeStruct((B * N, D), out_dtype),
        grid_spec=pltpu.PrefetchScalarGridSpec(
            num_scalar_prefetch=0,
            grid=grid,
            in_specs=[
                pl.BlockSpec((m_block, D), lambda i: (i, 0)),
                # Constant operands: whole-array VMEM residents (single copy,
                # no double buffering -> halves their VMEM footprint on v7x).
                pl.BlockSpec(memory_space=pltpu.MemorySpace.VMEM),  # w_qkv
                pl.BlockSpec(memory_space=pltpu.MemorySpace.VMEM),  # b_qkv
                pl.BlockSpec(memory_space=pltpu.MemorySpace.VMEM),  # w_out
                pl.BlockSpec(memory_space=pltpu.MemorySpace.VMEM),  # b_out
            ],
            out_specs=pl.BlockSpec((m_block, D), lambda i: (i, 0)),
            scratch_shapes=[
                pltpu.VMEM((m_block, 3 * inner_dim), jnp.bfloat16),  # QKV
                pltpu.VMEM((m_block, inner_dim), jnp.bfloat16),      # head outs
            ],
        ),
        compiler_params=pltpu.CompilerParams(
            dimension_semantics=("parallel",),
            vmem_limit_bytes=vmem_limit),
    )(x2, w_qkv16, b_qkv2, w_out16, b_out2)

    return out.reshape(B, N, D)


def reference_forward(x, w_qkv, b_qkv, w_out, b_out, *, num_heads, head_dim):
    """Pure-JAX f32 reference matching the PyTorch module (eval mode)."""
    B, N, D = x.shape
    inner_dim = num_heads * head_dim
    scale = head_dim ** (-0.5)
    qkv = x @ w_qkv + b_qkv
    q, k, v = jnp.split(qkv, 3, axis=-1)

    def split_heads(t):
        return t.reshape(B, N, num_heads, head_dim).transpose(0, 2, 1, 3)

    q, k, v = map(split_heads, (q, k, v))
    dots = jnp.einsum('bhid,bhjd->bhij', q, k) * scale
    attn = jax.nn.softmax(dots, axis=-1)
    out = jnp.einsum('bhij,bhjd->bhid', attn, v)
    out = out.transpose(0, 2, 1, 3).reshape(B, N, inner_dim)
    return out @ w_out + b_out


if __name__ == "__main__":
    # small shapes consistent with the module
    B, N = 2, 8
    dim, num_heads, head_dim = 32, 4, 8
    inner_dim = num_heads * head_dim

    key = jax.random.PRNGKey(0)
    k_x, k_wq, k_bq, k_wo, k_bo = jax.random.split(key, 5)

    x = jax.random.normal(k_x, (B, N, dim), dtype=jnp.float32)

    # deterministic parameter init mimicking nn.Linear's uniform(-1/sqrt(fan_in), ...)
    bound_qkv = 1.0 / math.sqrt(dim)
    w_qkv = jax.random.uniform(k_wq, (dim, 3 * inner_dim),
                               minval=-bound_qkv, maxval=bound_qkv, dtype=jnp.float32)
    b_qkv = jax.random.uniform(k_bq, (3 * inner_dim,),
                               minval=-bound_qkv, maxval=bound_qkv, dtype=jnp.float32)

    bound_out = 1.0 / math.sqrt(inner_dim)
    w_out = jax.random.uniform(k_wo, (inner_dim, dim),
                               minval=-bound_out, maxval=bound_out, dtype=jnp.float32)
    b_out = jax.random.uniform(k_bo, (dim,),
                               minval=-bound_out, maxval=bound_out, dtype=jnp.float32)

    y = attention_forward(x, w_qkv, b_qkv, w_out, b_out,
                          num_heads=num_heads, head_dim=head_dim)
    y = jax.block_until_ready(y)

    y_ref = reference_forward(x, w_qkv, b_qkv, w_out, b_out,
                              num_heads=num_heads, head_dim=head_dim)
    # bf16 matmul operands (+ bf16 exp on v6e/v7x) + approx reciprocal
    assert jnp.allclose(y, y_ref, atol=3e-2, rtol=3e-2), "mismatch vs reference"

    print("KERNEL_OK")
</pallas_src>

<mosaic_0001>
module attributes {stable_mosaic.version = 11 : i64} {
  func.func @kernel(%arg0: i32, %arg1: memref<8x32xbf16, #tpu.memory_space<vmem>>, %arg2: memref<32x96xbf16, #tpu.memory_space<vmem>>, %arg3: memref<1x96xf32, #tpu.memory_space<vmem>>, %arg4: memref<32x32xbf16, #tpu.memory_space<vmem>>, %arg5: memref<1x32xf32, #tpu.memory_space<vmem>>, %arg6: memref<8x32xf32, #tpu.memory_space<vmem>>, %arg7: memref<8x96xbf16, #tpu.memory_space<vmem>>, %arg8: memref<8x32xbf16, #tpu.memory_space<vmem>>) attributes {dimension_semantics = [#tpu.dimension_semantics<parallel>], iteration_bounds = array<i64: 2>, scalar_prefetch = 0 : i64, scratch_operands = 2 : i64, tpu.core_type = #tpu.core_type<tc>, window_params = [{transform_indices = @transform_0, window_bounds = array<i64: 8, 32>}, {pipeline_mode = #tpu.pipeline_mode<synchronous>, transform_indices = @transform_1, window_bounds = array<i64: 32, 96>}, {pipeline_mode = #tpu.pipeline_mode<synchronous>, transform_indices = @transform_2, window_bounds = array<i64: 1, 96>}, {pipeline_mode = #tpu.pipeline_mode<synchronous>, transform_indices = @transform_3, window_bounds = array<i64: 32, 32>}, {pipeline_mode = #tpu.pipeline_mode<synchronous>, transform_indices = @transform_4, window_bounds = array<i64: 1, 32>}, {transform_indices = @transform_5, window_bounds = array<i64: 8, 32>}]} {
    %c0 = arith.constant 0 : index
    %c0_0 = arith.constant 0 : index
    %0 = vector.load %arg1[%c0, %c0_0] : memref<8x32xbf16, #tpu.memory_space<vmem>>, vector<8x32xbf16>
    %c0_1 = arith.constant 0 : index
    %c0_2 = arith.constant 0 : index
    %1 = vector.load %arg2[%c0_1, %c0_2] : memref<32x96xbf16, #tpu.memory_space<vmem>>, vector<32x96xbf16>
    %cst = arith.constant dense<0.000000e+00> : vector<8x96xf32>
    %2 = tpu.matmul %0, %1, %cst {dimension_numbers = #tpu.dot_dimension_numbers<[1], [0], [0], [1], [0, 0, 1, 1], [], []>} : vector<8x32xbf16>, vector<32x96xbf16>, vector<8x96xf32> -> vector<8x96xf32>
    %c0_3 = arith.constant 0 : index
    %c0_4 = arith.constant 0 : index
    %3 = vector.load %arg3[%c0_3, %c0_4] : memref<1x96xf32, #tpu.memory_space<vmem>>, vector<1x96xf32>
    %4 = vector.shape_cast %3 : vector<1x96xf32> to vector<96xf32>
    %5 = vector.shape_cast %4 : vector<96xf32> to vector<1x96xf32>
    %6 = vector.broadcast %5 : vector<1x96xf32> to vector<8x96xf32>
    %7 = arith.addf %2, %6 : vector<8x96xf32>
    %8 = vector.extract_strided_slice %7 {offsets = [0, 0], sizes = [8, 32], strides = [1, 1]} : vector<8x96xf32> to vector<8x32xf32>
    %cst_5 = arith.constant 0.353553385 : f32
    %9 = vector.broadcast %cst_5 : f32 to vector<8x32xf32>
    %10 = arith.mulf %8, %9 : vector<8x32xf32>
    %11 = arith.truncf %10 : vector<8x32xf32> to vector<8x32xbf16>
    %c0_6 = arith.constant 0 : index
    %c0_7 = arith.constant 0 : index
    %12 = vector.load %arg7[%c0_6, %c0_7] : memref<8x96xbf16, #tpu.memory_space<vmem>>, vector<8x32xbf16>
    tpu.vector_store %arg7[%c0_6, %c0_7], %11 {strides = array<i32>} : memref<8x96xbf16, #tpu.memory_space<vmem>>, vector<8x32xbf16>,
    %13 = vector.extract_strided_slice %7 {offsets = [0, 32], sizes = [8, 64], strides = [1, 1]} : vector<8x96xf32> to vector<8x64xf32>
    %14 = arith.truncf %13 : vector<8x64xf32> to vector<8x64xbf16>
    %c0_8 = arith.constant 0 : index
    %c32 = arith.constant 32 : index
    %15 = vector.load %arg7[%c0_8, %c32] : memref<8x96xbf16, #tpu.memory_space<vmem>>, vector<8x64xbf16>
    tpu.vector_store %arg7[%c0_8, %c32], %14 {strides = array<i32>} : memref<8x96xbf16, #tpu.memory_space<vmem>>, vector<8x64xbf16>,
    %c0_9 = arith.constant 0 : index
    %c0_10 = arith.constant 0 : index
    %16 = vector.load %arg7[%c0_9, %c0_10] : memref<8x96xbf16, #tpu.memory_space<vmem>>, vector<8x8xbf16>
    %cst_11 = arith.constant 0xFF800000 : f32
    %17 = vector.broadcast %cst_11 : f32 to vector<8x1xf32>
    %cst_12 = arith.constant 0.000000e+00 : f32
    %18 = vector.broadcast %cst_12 : f32 to vector<8x1xf32>
    %cst_13 = arith.constant 0.000000e+00 : f32
    %19 = vector.broadcast %cst_13 : f32 to vector<8x8xf32>
    %c0_14 = arith.constant 0 : index
    %c32_15 = arith.constant 32 : index
    %20 = vector.load %arg7[%c0_14, %c32_15] : memref<8x96xbf16, #tpu.memory_space<vmem>>, vector<8x8xbf16>
    %c0_16 = arith.constant 0 : index
    %c64 = arith.constant 64 : index
    %21 = vector.load %arg7[%c0_16, %c64] : memref<8x96xbf16, #tpu.memory_space<vmem>>, vector<8x8xbf16>
    %cst_17 = arith.constant dense<0.000000e+00> : vector<8x8xf32>
    %22 = tpu.matmul %16, %20, %cst_17 {dimension_numbers = #tpu.dot_dimension_numbers<[1], [1], [0], [0], [0, 0, 1, 0], [], []>} : vector<8x8xbf16>, vector<8x8xbf16>, vector<8x8xf32> -> vector<8x8xf32>
    %cst_18 = arith.constant dense<0xFF800000> : vector<8xf32>
    %23 = vector.multi_reduction <maximumf>, %22, %cst_18 [1] : vector<8x8xf32> to vector<8xf32>
    %24 = vector.shape_cast %23 : vector<8xf32> to vector<8x1xf32>
    %25 = arith.maximumf %17, %24 : vector<8x1xf32>
    %26 = arith.subf %17, %25 : vector<8x1xf32>
    %27 = math.exp %26 : vector<8x1xf32>
    %28 = vector.broadcast %25 : vector<8x1xf32> to vector<8x8xf32>
    %29 = arith.subf %22, %28 : vector<8x8xf32>
    %30 = arith.truncf %29 : vector<8x8xf32> to vector<8x8xbf16>
    %31 = math.exp %30 : vector<8x8xbf16>
    %32 = arith.mulf %27, %18 : vector<8x1xf32>
    %33 = arith.extf %31 : vector<8x8xbf16> to vector<8x8xf32>
    %cst_19 = arith.constant dense<0.000000e+00> : vector<8xf32>
    %34 = vector.multi_reduction <add>, %33, %cst_19 [1] : vector<8x8xf32> to vector<8xf32>
    %35 = vector.shape_cast %34 : vector<8xf32> to vector<8x1xf32>
    %36 = arith.addf %32, %35 : vector<8x1xf32>
    %37 = vector.broadcast %27 : vector<8x1xf32> to vector<8x8xf32>
    %38 = arith.mulf %37, %19 : vector<8x8xf32>
    %cst_20 = arith.constant dense<0.000000e+00> : vector<8x8xf32>
    %39 = tpu.matmul %31, %21, %cst_20 {dimension_numbers = #tpu.dot_dimension_numbers<[1], [0], [0], [1], [0, 0, 1, 1], [], []>} : vector<8x8xbf16>, vector<8x8xbf16>, vector<8x8xf32> -> vector<8x8xf32>
    %40 = arith.addf %38, %39 : vector<8x8xf32>
    %41 = tpu.reciprocal %36 {approx = true} : vector<8x1xf32> -> vector<8x1xf32>
    %42 = vector.broadcast %41 : vector<8x1xf32> to vector<8x8xf32>
    %43 = arith.mulf %40, %42 : vector<8x8xf32>
    %44 = arith.truncf %43 : vector<8x8xf32> to vector<8x8xbf16>
    %c0_21 = arith.constant 0 : index
    %c0_22 = arith.constant 0 : index
    %45 = vector.load %arg8[%c0_21, %c0_22] : memref<8x32xbf16, #tpu.memory_space<vmem>>, vector<8x8xbf16>
    tpu.vector_store %arg8[%c0_21, %c0_22], %44 {strides = array<i32>} : memref<8x32xbf16, #tpu.memory_space<vmem>>, vector<8x8xbf16>,
    %c0_23 = arith.constant 0 : index
    %c8 = arith.constant 8 : index
    %46 = vector.load %arg7[%c0_23, %c8] : memref<8x96xbf16, #tpu.memory_space<vmem>>, vector<8x8xbf16>
    %cst_24 = arith.constant 0xFF800000 : f32
    %47 = vector.broadcast %cst_24 : f32 to vector<8x1xf32>
    %cst_25 = arith.constant 0.000000e+00 : f32
    %48 = vector.broadcast %cst_25 : f32 to vector<8x1xf32>
    %cst_26 = arith.constant 0.000000e+00 : f32
    %49 = vector.broadcast %cst_26 : f32 to vector<8x8xf32>
    %c0_27 = arith.constant 0 : index
    %c40 = arith.constant 40 : index
    %50 = vector.load %arg7[%c0_27, %c40] : memref<8x96xbf16, #tpu.memory_space<vmem>>, vector<8x8xbf16>
    %c0_28 = arith.constant 0 : index
    %c72 = arith.constant 72 : index
    %51 = vector.load %arg7[%c0_28, %c72] : memref<8x96xbf16, #tpu.memory_space<vmem>>, vector<8x8xbf16>
    %cst_29 = arith.constant dense<0.000000e+00> : vector<8x8xf32>
    %52 = tpu.matmul %46, %50, %cst_29 {dimension_numbers = #tpu.dot_dimension_numbers<[1], [1], [0], [0], [0, 0, 1, 0], [], []>} : vector<8x8xbf16>, vector<8x8xbf16>, vector<8x8xf32> -> vector<8x8xf32>
    %cst_30 = arith.constant dense<0xFF800000> : vector<8xf32>
    %53 = vector.multi_reduction <maximumf>, %52, %cst_30 [1] : vector<8x8xf32> to vector<8xf32>
    %54 = vector.shape_cast %53 : vector<8xf32> to vector<8x1xf32>
    %55 = arith.maximumf %47, %54 : vector<8x1xf32>
    %56 = arith.subf %47, %55 : vector<8x1xf32>
    %57 = math.exp %56 : vector<8x1xf32>
    %58 = vector.broadcast %55 : vector<8x1xf32> to vector<8x8xf32>
    %59 = arith.subf %52, %58 : vector<8x8xf32>
    %60 = arith.truncf %59 : vector<8x8xf32> to vector<8x8xbf16>
    %61 = math.exp %60 : vector<8x8xbf16>
    %62 = arith.mulf %57, %48 : vector<8x1xf32>
    %63 = arith.extf %61 : vector<8x8xbf16> to vector<8x8xf32>
    %cst_31 = arith.constant dense<0.000000e+00> : vector<8xf32>
    %64 = vector.multi_reduction <add>, %63, %cst_31 [1] : vector<8x8xf32> to vector<8xf32>
    %65 = vector.shape_cast %64 : vector<8xf32> to vector<8x1xf32>
    %66 = arith.addf %62, %65 : vector<8x1xf32>
    %67 = vector.broadcast %57 : vector<8x1xf32> to vector<8x8xf32>
    %68 = arith.mulf %67, %49 : vector<8x8xf32>
    %cst_32 = arith.constant dense<0.000000e+00> : vector<8x8xf32>
    %69 = tpu.matmul %61, %51, %cst_32 {dimension_numbers = #tpu.dot_dimension_numbers<[1], [0], [0], [1], [0, 0, 1, 1], [], []>} : vector<8x8xbf16>, vector<8x8xbf16>, vector<8x8xf32> -> vector<8x8xf32>
    %70 = arith.addf %68, %69 : vector<8x8xf32>
    %71 = tpu.reciprocal %66 {approx = true} : vector<8x1xf32> -> vector<8x1xf32>
    %72 = vector.broadcast %71 : vector<8x1xf32> to vector<8x8xf32>
    %73 = arith.mulf %70, %72 : vector<8x8xf32>
    %74 = arith.truncf %73 : vector<8x8xf32> to vector<8x8xbf16>
    %c0_33 = arith.constant 0 : index
    %c8_34 = arith.constant 8 : index
    %75 = vector.load %arg8[%c0_33, %c8_34] : memref<8x32xbf16, #tpu.memory_space<vmem>>, vector<8x8xbf16>
    tpu.vector_store %arg8[%c0_33, %c8_34], %74 {strides = array<i32>} : memref<8x32xbf16, #tpu.memory_space<vmem>>, vector<8x8xbf16>,
    %c0_35 = arith.constant 0 : index
    %c16 = arith.constant 16 : index
    %76 = vector.load %arg7[%c0_35, %c16] : memref<8x96xbf16, #tpu.memory_space<vmem>>, vector<8x8xbf16>
    %cst_36 = arith.constant 0xFF800000 : f32
    %77 = vector.broadcast %cst_36 : f32 to vector<8x1xf32>
    %cst_37 = arith.constant 0.000000e+00 : f32
    %78 = vector.broadcast %cst_37 : f32 to vector<8x1xf32>
    %cst_38 = arith.constant 0.000000e+00 : f32
    %79 = vector.broadcast %cst_38 : f32 to vector<8x8xf32>
    %c0_39 = arith.constant 0 : index
    %c48 = arith.constant 48 : index
    %80 = vector.load %arg7[%c0_39, %c48] : memref<8x96xbf16, #tpu.memory_space<vmem>>, vector<8x8xbf16>
    %c0_40 = arith.constant 0 : index
    %c80 = arith.constant 80 : index
    %81 = vector.load %arg7[%c0_40, %c80] : memref<8x96xbf16, #tpu.memory_space<vmem>>, vector<8x8xbf16>
    %cst_41 = arith.constant dense<0.000000e+00> : vector<8x8xf32>
    %82 = tpu.matmul %76, %80, %cst_41 {dimension_numbers = #tpu.dot_dimension_numbers<[1], [1], [0], [0], [0, 0, 1, 0], [], []>} : vector<8x8xbf16>, vector<8x8xbf16>, vector<8x8xf32> -> vector<8x8xf32>
    %cst_42 = arith.constant dense<0xFF800000> : vector<8xf32>
    %83 = vector.multi_reduction <maximumf>, %82, %cst_42 [1] : vector<8x8xf32> to vector<8xf32>
    %84 = vector.shape_cast %83 : vector<8xf32> to vector<8x1xf32>
    %85 = arith.maximumf %77, %84 : vector<8x1xf32>
    %86 = arith.subf %77, %85 : vector<8x1xf32>
    %87 = math.exp %86 : vector<8x1xf32>
    %88 = vector.broadcast %85 : vector<8x1xf32> to vector<8x8xf32>
    %89 = arith.subf %82, %88 : vector<8x8xf32>
    %90 = arith.truncf %89 : vector<8x8xf32> to vector<8x8xbf16>
    %91 = math.exp %90 : vector<8x8xbf16>
    %92 = arith.mulf %87, %78 : vector<8x1xf32>
    %93 = arith.extf %91 : vector<8x8xbf16> to vector<8x8xf32>
    %cst_43 = arith.constant dense<0.000000e+00> : vector<8xf32>
    %94 = vector.multi_reduction <add>, %93, %cst_43 [1] : vector<8x8xf32> to vector<8xf32>
    %95 = vector.shape_cast %94 : vector<8xf32> to vector<8x1xf32>
    %96 = arith.addf %92, %95 : vector<8x1xf32>
    %97 = vector.broadcast %87 : vector<8x1xf32> to vector<8x8xf32>
    %98 = arith.mulf %97, %79 : vector<8x8xf32>
    %cst_44 = arith.constant dense<0.000000e+00> : vector<8x8xf32>
    %99 = tpu.matmul %91, %81, %cst_44 {dimension_numbers = #tpu.dot_dimension_numbers<[1], [0], [0], [1], [0, 0, 1, 1], [], []>} : vector<8x8xbf16>, vector<8x8xbf16>, vector<8x8xf32> -> vector<8x8xf32>
    %100 = arith.addf %98, %99 : vector<8x8xf32>
    %101 = tpu.reciprocal %96 {approx = true} : vector<8x1xf32> -> vector<8x1xf32>
    %102 = vector.broadcast %101 : vector<8x1xf32> to vector<8x8xf32>
    %103 = arith.mulf %100, %102 : vector<8x8xf32>
    %104 = arith.truncf %103 : vector<8x8xf32> to vector<8x8xbf16>
    %c0_45 = arith.constant 0 : index
    %c16_46 = arith.constant 16 : index
    %105 = vector.load %arg8[%c0_45, %c16_46] : memref<8x32xbf16, #tpu.memory_space<vmem>>, vector<8x8xbf16>
    tpu.vector_store %arg8[%c0_45, %c16_46], %104 {strides = array<i32>} : memref<8x32xbf16, #tpu.memory_space<vmem>>, vector<8x8xbf16>,
    %c0_47 = arith.constant 0 : index
    %c24 = arith.constant 24 : index
    %106 = vector.load %arg7[%c0_47, %c24] : memref<8x96xbf16, #tpu.memory_space<vmem>>, vector<8x8xbf16>
    %cst_48 = arith.constant 0xFF800000 : f32
    %107 = vector.broadcast %cst_48 : f32 to vector<8x1xf32>
    %cst_49 = arith.constant 0.000000e+00 : f32
    %108 = vector.broadcast %cst_49 : f32 to vector<8x1xf32>
    %cst_50 = arith.constant 0.000000e+00 : f32
    %109 = vector.broadcast %cst_50 : f32 to vector<8x8xf32>
    %c0_51 = arith.constant 0 : index
    %c56 = arith.constant 56 : index
    %110 = vector.load %arg7[%c0_51, %c56] : memref<8x96xbf16, #tpu.memory_space<vmem>>, vector<8x8xbf16>
    %c0_52 = arith.constant 0 : index
    %c88 = arith.constant 88 : index
    %111 = vector.load %arg7[%c0_52, %c88] : memref<8x96xbf16, #tpu.memory_space<vmem>>, vector<8x8xbf16>
    %cst_53 = arith.constant dense<0.000000e+00> : vector<8x8xf32>
    %112 = tpu.matmul %106, %110, %cst_53 {dimension_numbers = #tpu.dot_dimension_numbers<[1], [1], [0], [0], [0, 0, 1, 0], [], []>} : vector<8x8xbf16>, vector<8x8xbf16>, vector<8x8xf32> -> vector<8x8xf32>
    %cst_54 = arith.constant dense<0xFF800000> : vector<8xf32>
    %113 = vector.multi_reduction <maximumf>, %112, %cst_54 [1] : vector<8x8xf32> to vector<8xf32>
    %114 = vector.shape_cast %113 : vector<8xf32> to vector<8x1xf32>
    %115 = arith.maximumf %107, %114 : vector<8x1xf32>
    %116 = arith.subf %107, %115 : vector<8x1xf32>
    %117 = math.exp %116 : vector<8x1xf32>
    %118 = vector.broadcast %115 : vector<8x1xf32> to vector<8x8xf32>
    %119 = arith.subf %112, %118 : vector<8x8xf32>
    %120 = arith.truncf %119 : vector<8x8xf32> to vector<8x8xbf16>
    %121 = math.exp %120 : vector<8x8xbf16>
    %122 = arith.mulf %117, %108 : vector<8x1xf32>
    %123 = arith.extf %121 : vector<8x8xbf16> to vector<8x8xf32>
    %cst_55 = arith.constant dense<0.000000e+00> : vector<8xf32>
    %124 = vector.multi_reduction <add>, %123, %cst_55 [1] : vector<8x8xf32> to vector<8xf32>
    %125 = vector.shape_cast %124 : vector<8xf32> to vector<8x1xf32>
    %126 = arith.addf %122, %125 : vector<8x1xf32>
    %127 = vector.broadcast %117 : vector<8x1xf32> to vector<8x8xf32>
    %128 = arith.mulf %127, %109 : vector<8x8xf32>
    %cst_56 = arith.constant dense<0.000000e+00> : vector<8x8xf32>
    %129 = tpu.matmul %121, %111, %cst_56 {dimension_numbers = #tpu.dot_dimension_numbers<[1], [0], [0], [1], [0, 0, 1, 1], [], []>} : vector<8x8xbf16>, vector<8x8xbf16>, vector<8x8xf32> -> vector<8x8xf32>
    %130 = arith.addf %128, %129 : vector<8x8xf32>
    %131 = tpu.reciprocal %126 {approx = true} : vector<8x1xf32> -> vector<8x1xf32>
    %132 = vector.broadcast %131 : vector<8x1xf32> to vector<8x8xf32>
    %133 = arith.mulf %130, %132 : vector<8x8xf32>
    %134 = arith.truncf %133 : vector<8x8xf32> to vector<8x8xbf16>
    %c0_57 = arith.constant 0 : index
    %c24_58 = arith.constant 24 : index
    %135 = vector.load %arg8[%c0_57, %c24_58] : memref<8x32xbf16, #tpu.memory_space<vmem>>, vector<8x8xbf16>
    tpu.vector_store %arg8[%c0_57, %c24_58], %134 {strides = array<i32>} : memref<8x32xbf16, #tpu.memory_space<vmem>>, vector<8x8xbf16>,
    %c0_59 = arith.constant 0 : index
    %c0_60 = arith.constant 0 : index
    %136 = vector.load %arg8[%c0_59, %c0_60] : memref<8x32xbf16, #tpu.memory_space<vmem>>, vector<8x32xbf16>
    %c0_61 = arith.constant 0 : index
    %c0_62 = arith.constant 0 : index
    %137 = vector.load %arg4[%c0_61, %c0_62] : memref<32x32xbf16, #tpu.memory_space<vmem>>, vector<32x32xbf16>
    %cst_63 = arith.constant dense<0.000000e+00> : vector<8x32xf32>
    %138 = tpu.matmul %136, %137, %cst_63 {dimension_numbers = #tpu.dot_dimension_numbers<[1], [0], [0], [1], [0, 0, 1, 1], [], []>} : vector<8x32xbf16>, vector<32x32xbf16>, vector<8x32xf32> -> vector<8x32xf32>
    %c0_64 = arith.constant 0 : index
    %c0_65 = arith.constant 0 : index
    %139 = vector.load %arg5[%c0_64, %c0_65] : memref<1x32xf32, #tpu.memory_space<vmem>>, vector<1x32xf32>
    %140 = vector.shape_cast %139 : vector<1x32xf32> to vector<32xf32>
    %141 = vector.shape_cast %140 : vector<32xf32> to vector<1x32xf32>
    %142 = vector.broadcast %141 : vector<1x32xf32> to vector<8x32xf32>
    %143 = arith.addf %138, %142 : vector<8x32xf32>
    %c0_66 = arith.constant 0 : index
    %c0_67 = arith.constant 0 : index
    %144 = vector.load %arg6[%c0_66, %c0_67] : memref<8x32xf32, #tpu.memory_space<vmem>>, vector<8x32xf32>
    tpu.vector_store %arg6[%c0_66, %c0_67], %143 {strides = array<i32>} : memref<8x32xf32, #tpu.memory_space<vmem>>, vector<8x32xf32>,
    return
  }
  func.func @transform_0(%arg0: i32) -> (i32, i32) {
    %c0_i32 = arith.constant 0 : i32
    %c0_i32_0 = arith.constant 0 : i32
    return %arg0, %c0_i32 : i32, i32
  }
  func.func @transform_1(%arg0: i32) -> (i32, i32) {
    %c0_i32 = arith.constant 0 : i32
    %c0_i32_0 = arith.constant 0 : i32
    %c0_i32_1 = arith.constant 0 : i32
    return %c0_i32, %c0_i32_0 : i32, i32
  }
  func.func @transform_2(%arg0: i32) -> (i32, i32) {
    %c0_i32 = arith.constant 0 : i32
    %c0_i32_0 = arith.constant 0 : i32
    %c0_i32_1 = arith.constant 0 : i32
    return %c0_i32, %c0_i32_0 : i32, i32
  }
  func.func @transform_3(%arg0: i32) -> (i32, i32) {
    %c0_i32 = arith.constant 0 : i32
    %c0_i32_0 = arith.constant 0 : i32
    %c0_i32_1 = arith.constant 0 : i32
    return %c0_i32, %c0_i32_0 : i32, i32
  }
  func.func @transform_4(%arg0: i32) -> (i32, i32) {
    %c0_i32 = arith.constant 0 : i32
    %c0_i32_0 = arith.constant 0 : i32
    %c0_i32_1 = arith.constant 0 : i32
    return %c0_i32, %c0_i32_0 : i32, i32
  }
  func.func @transform_5(%arg0: i32) -> (i32, i32) {
    %c0_i32 = arith.constant 0 : i32
    %c0_i32_0 = arith.constant 0 : i32
    return %arg0, %c0_i32 : i32, i32
  }
}

</mosaic_0001>

<bundles_post_ra>
// kernel: tpu_custom_call.1
= control target key start
LH: loop header
LB: loop body
LE: loop exit
PB: predicated region body
PF: predicated region fallthrough
CT: control target
= control target key end

     0   :  { %10 = vsyncpa [#allocation5], 0  ;;  %s1742_s0 = inlined_call_operand.hbm [shape: bf16[16,32], index: 0, kind: input, shape index: {}]   ;;  %s1743_s1 = inlined_call_operand.hbm [shape: bf16[32,96], index: 1, kind: input, shape index: {}]   ;;  %s1744_s2 = inlined_call_operand.vmem [shape: f32[1,96], index: 2, kind: input, shape index: {}]   ;;  %s1745_s3 = inlined_call_operand.hbm [shape: bf16[32,32], index: 3, kind: input, shape index: {}]   ;;  %s1746_s4 = inlined_call_operand.vmem [shape: f32[1,32], index: 4, kind: input, shape index: {}]   ;;  %s1747_s5 = inlined_call_operand.hbm [shape: f32[16,32], index: 5, kind: output, shape index: {}]  }
   0x1   :  { %12 = vsyncpa [#allocation5 + $0x1], 0 }
   0x2   :  { %13 = vsyncpa [#allocation8], 0 }
   0x3   :  { %14 = vsyncpa [#allocation6], 0 }
   0x4   :  { %16 = vsyncpa [#allocation6 + $0x1], 0  ;;  %s1481_s18 = smov 0   ;;  %s1483_s19 = smov 0  }
   0x5   :  { %s1485_s20 = smov 0   ;;  %s1487_s21 = smov 0  }
   0x6 LB: > { %s1502_s22 = sadd.s32 4294967295, %s1427_s21   ;;  %s1034_s23 = sadd.s32 4294967294, %s1427_s21   ;;  %s1427_s21 = sphi %s1487_s21, %s1769_s21   ;;  %s1423_s20 = sphi %s1485_s20, %s1768_s20   ;;  %s1419_s19 = sphi %s1483_s19, %s1767_s19   ;;  %s1415_s18 = sphi %s1481_s18, %s1766_s18  }
   0x7   : > { %p42_p0 = scmp.ne.s32.totalorder %s1419_s19, %s1415_s18  ;;  %p1748_p1 = scmp.eq.s32.totalorder %s1502_s22, 0 }
   0x8   : > { %p156_p3 = scmp.eq.s32.totalorder %s1034_s23, 1  ;;  %p1035_p5 = scmp.ge.s32.totalorder %s1427_s21, 1 }
   0x9   : > { %p1511_p4 = por %p1748_p1, %p42_p0  ;;  %p163_p7 = scmp.lt.s32.totalorder %s1427_s21, 3 }
   0xa   : > { %p1516_p6 = por %p156_p3, %p42_p0  ;;  %s1429_s27 = smov [#allocation7]  }
   0xb   : > { %s1752_s24 = scalar_select %p1511_p4, 1, 0 }
   0xc   : > { %s1753_s25 = scalar_select %p1516_p6, 1, 0 }
   0xd   : > { %p1521_p8 = pnand %p1035_p5, %p163_p7  ;;  %s175_s28 = sshll.u32 %s1429_s27, 4  ;;  %s176_s28 = int_to_ptr.vmem [resolvable:$true] %s175_s28 }
   0xe   : > { %s1430_s30 = smov [#allocation9]   ;;  %s1290_s7 = scalar_lea.vmem %s176_s28, 256 }
   0xf   : > { %s1754_s26 = scalar_select %p1521_p8, 1, 0 }
  0x10   : > { %p1174_p9 = pneg %p1521_p8  ;;  %s191_s6 = sshll.u32 %s1430_s30, 4  ;;  %s192_s6 = int_to_ptr.vmem [resolvable:$true] %s191_s6 }
  0x11   : > { %p1291_p13 = scmp.ne.s32.totalorder %s176_s28, %s1290_s7  ;;  %p1298_p5 = scmp.lt.s32.totalorder %s176_s28, %s176_s28 }
  0x12   : > { %p1530_p11 = pnand %p1174_p9, %p1748_p1  ;;  %p1299_p7 = scmp.lt.s32.totalorder %s1290_s7, %s1290_s7 }
  0x14   : > { %p1281_p12 = pneg %p1530_p11  ;;  %p1300_p10 = por %p1299_p7, %p1298_p5 }
  0x16   : > { %p1293_p0 = pnand %p1291_p13, %p1281_p12 }
  0x18   : > { %p1294_p3 = pneg %p1293_p0 }
  0x1a   : > { %p1301_p9 = pnand %p1300_p10, %p1294_p3 }
  0x1c   : > { %1304 = shalt.err (!%p1301_p9)
}
  0x1d   : > { %s1431_s8 = smov 64   ;;  %s1432_s9 = smov 4  }
  0x1e   : > { %1177 = dma.hbm_to_vmem [thread:$0]  (!%p1530_p11), %s1743_s1, 256, %s176_s28, [#allocation8], %s1431_s8, %s1431_s8, %s1432_s9  }
  0x1f   : > { %s1316_s12 = scalar_lea.vmem %s192_s6, 256  ;;  %p1324_p2 = scmp.lt.s32.totalorder %s192_s6, %s192_s6 }
  0x20   : > { %p1317_p1 = scmp.ne.s32.totalorder %s192_s6, %s1316_s12  ;;  %p1325_p6 = scmp.lt.s32.totalorder %s1316_s12, %s1316_s12 }
  0x22   : > { %p1319_p13 = pnand %p1317_p1, %p1281_p12  ;;  %p1326_p5 = por %p1325_p6, %p1324_p2 }
  0x24   : > { %p1320_p0 = pneg %p1319_p13 }
  0x26   : > { %p1327_p10 = pnand %p1326_p5, %p1320_p0 }
  0x28   : > { %1330 = shalt.err (!%p1327_p10)
}
  0x29   : > { %1180 = dma.hbm_to_vmem [thread:$0]  (!%p1530_p11), %s1745_s3, 256, %s192_s6, [#allocation8], %s1431_s8, %s1431_s8, %s1432_s9  }
  0x2a   : > { %s1553_s15 = sadd.s32 1, %s1427_s21   ;;  %s29_s16 = sadd.s32 1, %s1423_s20 }
  0x2b   : > { %s26_s17 = ssub.s32 %s1427_s21, %s1553_s15  ;;  %p36_p1 = scmp.ne.s32.totalorder %s1423_s20, %s1419_s19 }
  0x2c   : > { %p27_p2 = scmp.eq.s32.totalorder %s26_s17, 0  ;;  %p37_p6 = scmp.eq.s32.totalorder %s1427_s21, 0 }
  0x2d   : > { %p1756_p12 = scmp.eq.s32.totalorder %s1502_s22, 1  ;;  %p1191_p7 = scmp.lt.s32.totalorder %s1427_s21, 2 }
  0x2e   : > { %s1569_s27 = scalar_select %p27_p2, %s1423_s20, %s29_s16  }
  0x2f   : > { %p1563_p3 = por %p1756_p12, %p36_p1  ;;  %p38_p9 = por %p37_p6, %p36_p1 }
  0x30   : > { %s208_s28 = sand.u32 1, %s1423_s20   ;;  %s1040_s30 = sshll.u32 %s1427_s21, 6 }
  0x31   : > { %s1757_s23 = scalar_select %p1563_p3, 1, 0 }
  0x32   : > { %s1039_s29 = sshll.u32 %s208_s28, 2  ;;  %s1576_s8 = scalar_lea.hbm %s1742_s0, %s1040_s30 }
  0x33   : > { %s212_s9 = scalar_lea.vmem [#allocation4], %s1039_s29  ;;  %p1578_p11 = pnand %p1191_p7, %p38_p9 }
  0x34   : > { %s219_s10 = sshll.u32 %s212_s9, 4  ;;  %s209_s12 = scalar_lea.sflag [#allocation5], %s208_s28  ;;  %s220_s10 = int_to_ptr.vmem [resolvable:$true] %s219_s10 }
  0x35   : > { %s1331_s13 = scalar_lea.hbm %s1576_s8, 64  ;;  %p1333_p0 = pneg %p1578_p11 }
  0x36   : > { %p1332_p13 = scmp.ne.s32.totalorder %s1576_s8, %s1331_s13  ;;  %s1336_s17 = scalar_lea.hbm %s1742_s0, 128 }
  0x37   : > { %p1337_p1 = scmp.lt.s32.totalorder %s1576_s8, %s1742_s0  ;;  %p1338_p2 = scmp.lt.s32.totalorder %s1336_s17, %s1331_s13 }
  0x38   : > { %p1334_p5 = pnand %p1333_p0, %p1332_p13 }
  0x39   : > { %p1339_p6 = por %p1338_p2, %p1337_p1 }
  0x3a   : > { %p1335_p10 = pneg %p1334_p5 }
  0x3c   : > { %p1340_p12 = pnand %p1339_p6, %p1335_p10 }
  0x3e   : > { %1343 = shalt.err (!%p1340_p12)
}
  0x3f   : > { %s1344_s6 = scalar_lea.vmem %s220_s10, 64  ;;  %s1433_s28 = smov [#allocation4]  }
  0x40   : > { %p1345_p7 = scmp.ne.s32.totalorder %s220_s10, %s1344_s6  ;;  %s1349_s7 = sshll.u32 %s1433_s28, 4  ;;  %s1350_s7 = int_to_ptr.vmem [resolvable:$false] %s1349_s7 }
  0x41   : > { %s1351_s9 = scalar_lea.vmem %s1350_s7, 128  ;;  %p1352_p13 = scmp.lt.s32.totalorder %s220_s10, %s1350_s7 }
  0x42   : > { %p1347_p9 = pnand %p1345_p7, %p1333_p0  ;;  %p1353_p5 = scmp.lt.s32.totalorder %s1351_s9, %s1344_s6 }
  0x44   : > { %p1348_p3 = pneg %p1347_p9  ;;  %p1354_p4 = por %p1353_p5, %p1352_p13 }
  0x46   : > { %p1355_p8 = pnand %p1354_p4, %p1348_p3 }
  0x48   : > { %1358 = shalt.err (!%p1355_p8)
}
  0x49   : > { %1184 = dma.hbm_to_vmem [thread:$0]  (!%p1578_p11), %s1576_s8, 64, %s220_s10, %s209_s12  }
  0x4a   : > { %p1759_p10 = scmp.ne.s32.totalorder %s1754_s26, 0 }
  0x4b   : > { %s1599_s13 = sand.u32 (!%p1759_p10), 1, %s1419_s19   ;;  %p1760_p0 = scmp.ne.s32.totalorder (!%p1759_p10), %s1752_s24, 0 }
  0x4c   : > { %228 = sbr.rel (%p1759_p10) target bundleno = 1366 (0x556), region = 40  ;;  %s1042_s14 = sshll.u32 (!%p1759_p10), %s1599_s13, 2 }
  0x4d   : > { %s231_s16 = scalar_lea.sflag (!%p1759_p10), [#allocation5], %s1599_s13  ;;  %s234_s17 = scalar_lea.vmem (!%p1759_p10), [#allocation4], %s1042_s14 }
  0x51   : > { %1402 = dma.done.wait (%p1760_p0), %s231_s16, 64  }
  0x52   : > { %1404 = vsyncadd (%p1760_p0), %s231_s16, 4294967232  ;;  %p1761_p4 = scmp.eq.s32.totalorder %s1502_s22, 0 }
  0x54   : > { %1406 = dma.done.wait (%p1761_p4), [#allocation8], 512   ;;  %p1762_p8 = pmov %p1761_p4 }
  0x55   : > { %v1434_v0 = vmov 0.0   ;;  %vm1435_vm0 = vmmov 0   ;;  %v1247_v1 = vld [vmem:[#allocation7 + $0x8] sm:$0xff]   ;;  %v1248_v2 = vld [vmem:[#allocation7] sm:$0xff]   ;;  %v270_v3 = vld [vmem:[%s234_s17] sm:$0xf] }
  0x56   : > { %1408 = vsyncadd (%p1762_p8), [#allocation8], 4294966784  ;;  %1098 = vmatprep.subr.bf16.mxu0 %v1434_v0  ;;  %1102 = vmatprep.mubr.msk.bf16.mxu0 %vm1435_vm0, %v1434_v0  ;;  %vm294_vm1 = vcmask 261120   ;;  %v1046_v4 = vld [vmem:[%s1744_s2] ss:$0 sm:$0xff]  ;;  %vm340_vm2 = vcmask 257024  }
  0x57   : > { %1106 = vmatprep.subr.bf16.mxu1 %v1434_v0  ;;  %1108 = vmatprep.mubr.msk.bf16.mxu1 %vm1435_vm0, %v1434_v0  ;;  %vm343_vm3 = vcmask 781568   ;;  %s1436_s8 = smov 120   ;;  %s1437_s10 = smov 96   ;;  %vm351_vm4 = vcmask 64512   ;;  %vm420_vm5 = vcmask 1043456   ;;  %vm468_vm6 = vcmask 60416  }
  0x58   : > { %1099 = vmatpush3.bf16.msra.mxu0 %v1247_v1  ;;  %s1438_s11 = smov 80   ;;  %s1439_s12 = smov 88   ;;  %vm599_vm7 = vcmask 126016   ;;  %vm730_vm8 = vcmask 191616   ;;  %vm861_vm9 = vcmask 257216  }
  0x59   : > { %1100 = vmatprep.subr.bf16.mxu0 %v1434_v0  ;;  %s1440_s30 = smov 72   ;;  %s1441_s29 = smov 112  }
  0x5a   : > { %s1442_s6 = smov 104   ;;  %s1443_s28 = smov 56  }
  0x5b   : > { %s1444_s7 = smov 64   ;;  %s1445_s9 = smov 40  }
  0x5c   : > { %1101 = vmatpush3.bf16.msra.mxu0 %v1248_v2  ;;  %s1446_s14 = smov 48   ;;  %s1447_s16 = smov 8  }
  0x5d   : > { %1112 = vmatprep.subr.bf16.mxu0 %v1434_v0  ;;  %s1448_s17 = smov 16   ;;  %s1449_s24 = smov 24  }
  0x5e   : > { %s1045_s26 = sshll.u32 %s1599_s13, 3  ;;  %p1763_p11 = scmp.ne.s32.totalorder %s1757_s23, 0 }
  0x5f   : > { %1103 = vmatmul.mubr.msk.bf16.vlgmr.msra.gmra.mxu0 %vm294_vm1, %v270_v3 }
  0x60   : > { %1114 = vmatprep.mubr.msk.bf16.mxu0 %vm1435_vm0, %v1434_v0 }
 0x11f   : > { %v332_v5 = vpop.f32.mrf.mxu0 }
 0x120   : > { %v333_v6 = vadd.f32 %v1046_v4, %v332_v5 }
 0x121   : > { %v1104_v7 = vpop.f32.mrf.mxu0 }
 0x122   : > { %v338_v8 = vmul.f32 0.35355338, %v333_v6  ;;  %v342_v11 = vpack.c.bf16 %v333_v6, %v333_v6 }
 0x123   : > { %v335_v9 = vpop.f32.mrf.mxu0 }
 0x124   : > { %v339_v10 = vpack.c.bf16 %v338_v8, %v338_v8 }
 0x125   : > { %v1105_v12 = vpop.f32.mrf.mxu0 }
 0x126   : > { %341 = vst.msk [vmem:[#allocation2] sm:$0xf] %vm340_vm2, %v339_v10 }
 0x127   : > { %344 = vst.msk [vmem:[#allocation2] sm:$0xf] %vm343_vm3, %v342_v11 }
 0x12e   : > { %v1625_v13 = vld [vmem:[#allocation2] ss:$0 sps:$4 sm:$0xff]  }
 0x12f   : > { %v345_v14 = vld [vmem:[#allocation2] sm:$0xf]  ;;  %474 = vrot.lane.b32.xlu1 %v1625_v13, %s1436_s8 }
 0x130   : > { %v1627_v15 = vcombine.low %v345_v14, %v345_v14  ;;  %v1631_v16 = vld [vmem:[#allocation2] ss:$0 sps:$4 sm:$0xff]  }
 0x131   : > { %v1252_v17 = vld [vmem:[#allocation2] ss:$0 sps:$4 sm:$0xff]  }
 0x132   : > { %349 = vrot.lane.b32.xlu0 %v1627_v15, %s1437_s10 }
 0x133   : > { %607 = vrot.lane.b32.xlu1 %v1631_v16, %s1438_s11  ;;  %s1070_s11 = sshll.u32 %s1502_s22, 7 }
 0x136   : > { %476 = vrot.lane.b32.xlu0 %v1625_v13, %s1439_s12  ;;  %s268_s12 = scalar_lea.vmem [#allocation10], %s1045_s26 }
 0x137   : > { %738 = vrot.lane.b32.xlu1 %v1252_v17, %s1440_s30  ;;  %s945_s30 = sshll.u32 %s268_s12, 4  ;;  %s1700_s30 = int_to_ptr.vmem [resolvable:$true] %s945_s30 }
 0x138   : > { %s1359_s22 = scalar_lea.vmem %s1700_s30, 128 }
 0x139   : > { %p1360_p3 = scmp.ne.s32.totalorder %s1700_s30, %s1359_s22 }
 0x13a   : > { %605 = vrot.lane.b32.xlu0 %v1631_v16, %s1441_s29 }
 0x13b   : > { %p1361_p1 = pnand %p1360_p3, %p1763_p11 }
 0x13d   : > { %p1362_p2 = pneg %p1361_p1 }
 0x13e   : > { %736 = vrot.lane.b32.xlu0 %v1252_v17, %s1442_s6 }
 0x1a1   : > { %v475_v21 = vpop.permute.xlu1 %474 }
 0x1a4   : > { %v350_v18 = vpop.permute.xlu0 %349 }
 0x1a5   : > { %v356_v19 = vsel %vm351_vm4, %v350_v18, 0  ;;  %v608_v23 = vpop.permute.xlu1 %607 }
 0x1a6   : > { %1107 = vmatpush3.bf16.xpose.msra.mxu1 %v356_v19  ;;  %v613_v24 = vsel %vm351_vm4, %v608_v23, 0 }
 0x1a7   : > { %1118 = vmatprep.subr.bf16.mxu1 %v1434_v0 }
 0x1a8   : > { %v477_v20 = vpop.permute.xlu0 %476 }
 0x1a9   : > { %v482_v22 = vsel %vm351_vm4, %v477_v20, 0  ;;  %v739_v25 = vpop.permute.xlu1 %738 }
 0x1aa   : > { %v744_v27 = vsel %vm351_vm4, %v739_v25, 0 }
 0x1ac   : > { %v606_v26 = vpop.permute.xlu0 %605 }
 0x1ad   : > { %1109 = vmatmul.mubr.msk.bf16.vlgmr.msra.gmra.mxu1 %vm351_vm4, %v345_v14 }
 0x1ae   : > { %1119 = vmatpush3.bf16.xpose.msra.mxu1 %v482_v22  ;;  %1120 = vmatprep.mubr.msk.bf16.mxu1 %vm1435_vm0, %v1434_v0 }
 0x1af   : > { %1130 = vmatprep.subr.bf16.mxu1 %v1434_v0 }
 0x1b0   : > { %v737_v28 = vpop.permute.xlu0 %736 }
 0x1b5   : > { %1121 = vmatmul.mubr.msk.bf16.vlgmr.msra.gmra.mxu1 %vm351_vm4, %v475_v21 }
 0x1b6   : > { %1131 = vmatpush3.bf16.xpose.msra.mxu1 %v613_v24  ;;  %1132 = vmatprep.mubr.msk.bf16.mxu1 %vm1435_vm0, %v1434_v0 }
 0x1b7   : > { %1142 = vmatprep.subr.bf16.mxu1 %v1434_v0 }
 0x1bd   : > { %1133 = vmatmul.mubr.msk.bf16.vlgmr.msra.gmra.mxu1 %vm351_vm4, %v606_v26 }
 0x1be   : > { %1143 = vmatpush3.bf16.xpose.msra.mxu1 %v744_v27  ;;  %1144 = vmatprep.mubr.msk.bf16.mxu1 %vm1435_vm0, %v1434_v0 }
 0x1bf   : > { %1154 = vmatprep.subr.bf16.mxu1 %v1434_v0 }
 0x1c5   : > { %1145 = vmatmul.mubr.msk.bf16.vlgmr.msra.gmra.mxu1 %vm351_vm4, %v737_v28 }
 0x1c6   : > { %1158 = vmatprep.mubr.msk.bf16.mxu1 %vm1435_vm0, %v1434_v0 }
 0x26d   : > { %v392_v29 = vpop.f32.mrf.mxu1 }
 0x26e   : > { %v398_v30 = vsel %vm351_vm4, %v392_v29, -inf }
 0x26f   : > { %399 = vmax.xlane.f32.xlu1 %v398_v30  ;;  %v1110_v31 = vpop.f32.mrf.mxu1 }
 0x271   : > { %v395_v32 = vpop.f32.mrf.mxu1 }
 0x273   : > { %v1111_v33 = vpop.f32.mrf.mxu1 }
 0x275   : > { %v518_v34 = vpop.f32.mrf.mxu1 }
 0x276   : > { %v524_v35 = vsel %vm351_vm4, %v518_v34, -inf }
 0x277   : > { %525 = vmax.xlane.f32.xlu0 %v524_v35  ;;  %v1122_v36 = vpop.f32.mrf.mxu1 }
 0x279   : > { %v521_v37 = vpop.f32.mrf.mxu1 }
 0x27b   : > { %v1123_v38 = vpop.f32.mrf.mxu1 }
 0x27d   : > { %v649_v39 = vpop.f32.mrf.mxu1 }
 0x27e   : > { %v655_v40 = vsel %vm351_vm4, %v649_v39, -inf }
 0x27f   : > { %656 = vmax.xlane.f32.xlu0 %v655_v40  ;;  %v1134_v41 = vpop.f32.mrf.mxu1 }
 0x280   : > { %541 = vrot.lane.b32.xlu1 %v1625_v13, %s1443_s28  ;;  %s1698_s28 = scalar_lea.hbm %s1747_s5, %s1070_s11 }
 0x281   : > { %v652_v42 = vpop.f32.mrf.mxu1 }
 0x283   : > { %v1135_v43 = vpop.f32.mrf.mxu1 }
 0x285   : > { %v780_v44 = vpop.f32.mrf.mxu1 }
 0x286   : > { %v786_v48 = vsel %vm351_vm4, %v780_v44, -inf }
 0x287   : > { %v1146_v45 = vpop.f32.mrf.mxu1 }
 0x289   : > { %v783_v46 = vpop.f32.mrf.mxu1 }
 0x28b   : > { %v1147_v47 = vpop.f32.mrf.mxu1 }
 0x295   : > { %415 = vrot.lane.b32.xlu0 %v1627_v15, %s1444_s7  ;;  %s932_s7 = scalar_lea.sflag [#allocation6], %s1599_s13 }
 0x299   : > { %803 = vrot.lane.b32.xlu0 %v1252_v17, %s1445_s9  ;;  %s1450_s9 = smov [#allocation10]  }
 0x2a4   : > { %787 = vmax.xlane.f32.xlu1 %v786_v48 }
 0x2b5   : > { %672 = vrot.lane.b32.xlu1 %v1631_v16, %s1446_s14  ;;  %s1363_s14 = sshll.u32 %s1450_s9, 4  ;;  %s1364_s14 = int_to_ptr.vmem [resolvable:$false] %s1363_s14 }
 0x2b6   : > { %p1366_p6 = scmp.lt.s32.totalorder %s1700_s30, %s1364_s14 }
 0x2f8   : > { %v400_v49 = vpop.xlane.xlu1 %399 }
 0x2f9   : > { %v404_v50 = vsub.f32 %v392_v29, %v400_v49  ;;  %v401_v22 = vsub.f32 -inf, %v400_v49 }
 0x2fb   : > { %v405_v51 = vpack.c.bf16 %v404_v50, %v404_v50  ;;  %v402_v23 = vmul.f32 1.442695, %v401_v22 }
 0x2fc   : > { %v542_v63 = vpop.permute.xlu1 %541 }
 0x2fd   : > { %v407_v52 = vmul.bf16 1069105081, %v405_v51  ;;  %v547_v2 = vsel %vm420_vm5, %v542_v63, 0 }
 0x2ff   : > { %1255 = vpow.bf16 %v407_v52 }
 0x300   : > { %v526_v53 = vpop.xlane.xlu0 %525 }
 0x301   : > { %v530_v54 = vsub.f32 %v518_v34, %v526_v53  ;;  %v527_v24 = vsub.f32 -inf, %v526_v53 }
 0x303   : > { %v531_v55 = vpack.c.bf16 %v530_v54, %v530_v54  ;;  %v528_v25 = vmul.f32 1.442695, %v527_v24 }
 0x305   : > { %v533_v56 = vmul.bf16 1069105081, %v531_v55 }
 0x307   : > { %1257 = vpow.bf16 %v533_v56 }
 0x308   : > { %v1663_v57 = vpop.xlane.xlu0 %656 }
 0x309   : > { %v661_v58 = vsub.f32 %v649_v39, %v1663_v57  ;;  %v658_v34 = vsub.f32 -inf, %v1663_v57 }
 0x30b   : > { %v662_v59 = vpack.c.bf16 %v661_v58, %v661_v58  ;;  %v659_v35 = vmul.f32 1.442695, %v658_v34 }
 0x30c   : > { %v416_v60 = vpop.permute.xlu0 %415 }
 0x30d   : > { %v664_v61 = vmul.bf16 1069105081, %v662_v59  ;;  %v422_v62 = vsel %vm420_vm5, %v416_v60, 0  ;;  %v1256_v1 = vpop.eup %1255 }
 0x30e   : > { %1113 = vmatpush3.bf16.msra.mxu0 %v422_v62  ;;  %v410_v6 = vunpack.c.l.bf16 %v1256_v1 }
 0x30f   : > { %1259 = vpow.bf16 %v664_v61  ;;  %1124 = vmatprep.subr.bf16.mxu0 %v1434_v0 }
 0x310   : > { %v411_v7 = vsel %vm351_vm4, %v410_v6, 0.0  ;;  %v804_v17 = vpop.permute.xlu0 %803 }
 0x311   : > { %1115 = vmatmul.mubr.msk.bf16.vlgmr.msra.gmra.mxu0 %vm351_vm4, %v1256_v1  ;;  %v809_v18 = vsel %vm420_vm5, %v804_v17, 0 }
 0x312   : > { %1125 = vmatpush3.bf16.msra.mxu0 %v547_v2  ;;  %1126 = vmatprep.mubr.msk.bf16.mxu0 %vm1435_vm0, %v1434_v0 }
 0x313   : > { %1136 = vmatprep.subr.bf16.mxu0 %v1434_v0 }
 0x315   : > { %v1258_v3 = vpop.eup %1257 }
 0x316   : > { %v536_v4 = vunpack.c.l.bf16 %v1258_v3 }
 0x318   : > { %v537_v5 = vsel %vm351_vm4, %v536_v4, 0.0 }
 0x319   : > { %538 = vadd.xlane.f32.xlu1 %v537_v5  ;;  %1127 = vmatmul.mubr.msk.bf16.vlgmr.msra.gmra.mxu0 %vm351_vm4, %v1258_v3 }
 0x31a   : > { %1138 = vmatprep.mubr.msk.bf16.mxu0 %vm1435_vm0, %v1434_v0 }
 0x31d   : > { %v1260_v8 = vpop.eup %1259  ;;  %412 = vadd.xlane.f32.xlu1 %v411_v7  ;;  %v1253_v7 = vld [vmem:[#allocation9 + $0x8] sm:$0xff]  }
 0x31e   : > { %v667_v9 = vunpack.c.l.bf16 %v1260_v8  ;;  %1155 = vmatpush3.bf16.msra.mxu1 %v1253_v7 }
 0x31f   : > { %1156 = vmatprep.subr.bf16.mxu1 %v1434_v0 }
 0x320   : > { %v668_v10 = vsel %vm351_vm4, %v667_v9, 0.0 }
 0x321   : > { %669 = vadd.xlane.f32.xlu0 %v668_v10 }
 0x32d   : > { %v788_v11 = vpop.xlane.xlu1 %787 }
 0x32e   : > { %v792_v12 = vsub.f32 %v780_v44, %v788_v11  ;;  %v789_v45 = vsub.f32 -inf, %v788_v11 }
 0x330   : > { %v793_v13 = vpack.c.bf16 %v792_v12, %v792_v12  ;;  %v790_v51 = vmul.f32 1.442695, %v789_v45 }
 0x331   : > { %v673_v14 = vpop.permute.xlu1 %672 }
 0x332   : > { %v795_v15 = vmul.bf16 1069105081, %v793_v13  ;;  %v678_v16 = vsel %vm420_vm5, %v673_v14, 0 }
 0x333   : > { %1137 = vmatpush3.bf16.msra.mxu0 %v678_v16 }
 0x334   : > { %1261 = vpow.bf16 %v795_v15  ;;  %1148 = vmatprep.subr.bf16.mxu0 %v1434_v0 }
 0x335   : > { %1263 = vpow2.f32 %v402_v23 }
 0x336   : > { %1139 = vmatmul.mubr.msk.bf16.vlgmr.msra.gmra.mxu0 %vm351_vm4, %v1260_v8  ;;  %1265 = vpow2.f32 %v528_v25  ;;  %v1254_v8 = vld [vmem:[#allocation9] sm:$0xff]  }
 0x337   : > { %1149 = vmatpush3.bf16.msra.mxu0 %v809_v18  ;;  %1150 = vmatprep.mubr.msk.bf16.mxu0 %vm1435_vm0, %v1434_v0 }
 0x338   : > { %1157 = vmatpush3.bf16.msra.mxu1 %v1254_v8 }
 0x342   : > { %v1262_v19 = vpop.eup %1261 }
 0x343   : > { %1151 = vmatmul.mubr.msk.bf16.vlgmr.msra.gmra.mxu0 %vm351_vm4, %v1262_v19  ;;  %v798_v20 = vunpack.c.l.bf16 %v1262_v19  ;;  %v1264_v27 = vpop.eup %1263 }
 0x344   : > { %v409_v29 = vmul.f32 0.0, %v1264_v27  ;;  %v1266_v31 = vpop.eup %1265 }
 0x345   : > { %v799_v21 = vsel %vm351_vm4, %v798_v20, 0.0  ;;  %v535_v32 = vmul.f32 0.0, %v1266_v31  ;;  %v1065_v20 = vld [vmem:[%s1746_s4] ss:$0 sm:$0xff] }
 0x346   : > { %800 = vadd.xlane.f32.xlu0 %v799_v21 }
 0x3a2   : > { %v539_v26 = vpop.xlane.xlu1 %538 }
 0x3a3   : > { %v540_v33 = vadd.f32 %v539_v26, %v535_v32 }
 0x3a6   : > { %v413_v28 = vpop.xlane.xlu1 %412 }
 0x3a7   : > { %v414_v30 = vadd.f32 %v413_v28, %v409_v29 }
 0x3a9   : > { %1267 = vrcp.f32 %v414_v30 }
 0x3aa   : > { %1269 = vrcp.f32 %v540_v33  ;;  %v670_v55 = vpop.xlane.xlu0 %669 }
 0x3ab   : > { %1271 = vpow2.f32 %v659_v35 }
 0x3ac   : > { %1273 = vpow2.f32 %v790_v51 }
 0x3b6   : > { %v1268_v38 = vpop.eup %1267 }
 0x3b7   : > { %v1270_v47 = vpop.eup %1269 }
 0x3b8   : > { %v1272_v54 = vpop.eup %1271 }
 0x3b9   : > { %v666_v56 = vmul.f32 0.0, %v1272_v54  ;;  %v1274_v58 = vpop.eup %1273 }
 0x3ba   : > { %v797_v60 = vmul.f32 0.0, %v1274_v58 }
 0x3bb   : > { %v671_v57 = vadd.f32 %v670_v55, %v666_v56 }
 0x3bd   : > { %1275 = vrcp.f32 %v671_v57 }
 0x3ca   : > { %v1276_v1 = vpop.eup %1275 }
 0x3cf   : > { %v801_v59 = vpop.xlane.xlu0 %800 }
 0x3d0   : > { %v802_v61 = vadd.f32 %v801_v59, %v797_v60 }
 0x3d1   : > { %v458_v36 = vpop.f32.mrf.mxu0 }
 0x3d2   : > { %v464_v37 = vadd.f32 %v458_v36, %v409_v29  ;;  %1277 = vrcp.f32 %v802_v61 }
 0x3d3   : > { %v1116_v39 = vpop.f32.mrf.mxu0 }
 0x3d4   : > { %v466_v40 = vmul.f32 %v1268_v38, %v464_v37 }
 0x3d5   : > { %v461_v41 = vpop.f32.mrf.mxu0 }
 0x3d6   : > { %v467_v42 = vpack.c.bf16 %v466_v40, %v466_v40 }
 0x3d7   : > { %v1117_v43 = vpop.f32.mrf.mxu0 }
 0x3d8   : > { %469 = vst.msk [vmem:[#allocation3] sm:$0xf] %vm468_vm6, %v467_v42 }
 0x3d9   : > { %v583_v44 = vpop.f32.mrf.mxu0 }
 0x3da   : > { %v589_v46 = vadd.f32 %v583_v44, %v535_v32 }
 0x3db   : > { %v1128_v48 = vpop.f32.mrf.mxu0 }
 0x3dc   : > { %v591_v49 = vmul.f32 %v1270_v47, %v589_v46 }
 0x3dd   : > { %v586_v50 = vpop.f32.mrf.mxu0 }
 0x3de   : > { %v1073_v52 = vpack.c.bf16 %v591_v49, %v591_v49 }
 0x3df   : > { %v1129_v53 = vpop.f32.mrf.mxu0  ;;  %v1278_v11 = vpop.eup %1277 }
 0x3e0   : > { %596 = vrot.lane.b32.xlu0 %v1073_v52, %s1447_s16  ;;  %s1365_s16 = scalar_lea.vmem %s1364_s14, 256 }
 0x3e1   : > { %p1367_p12 = scmp.lt.s32.totalorder %s1365_s16, %s1359_s22 }
 0x3e3   : > { %p1368_p7 = por %p1367_p12, %p1366_p6 }
 0x3e5   : > { %p1369_p9 = pnand %p1368_p7, %p1362_p2 }
 0x3f6   : > { %v714_v62 = vpop.f32.mrf.mxu0 }
 0x3f7   : > { %v720_v63 = vadd.f32 %v714_v62, %v666_v56 }
 0x3f8   : > { %v1140_v2 = vpop.f32.mrf.mxu0 }
 0x3f9   : > { %v722_v3 = vmul.f32 %v1276_v1, %v720_v63 }
 0x3fa   : > { %v717_v4 = vpop.f32.mrf.mxu0 }
 0x3fb   : > { %v1074_v5 = vpack.c.bf16 %v722_v3, %v722_v3 }
 0x3fc   : > { %v1141_v6 = vpop.f32.mrf.mxu0 }
 0x3fd   : > { %727 = vrot.lane.b32.xlu1 %v1074_v5, %s1448_s17 }
 0x403   : > { %v845_v9 = vpop.f32.mrf.mxu0 }
 0x404   : > { %v851_v10 = vadd.f32 %v845_v9, %v797_v60 }
 0x405   : > { %v1152_v12 = vpop.f32.mrf.mxu0 }
 0x406   : > { %v853_v13 = vmul.f32 %v1278_v11, %v851_v10 }
 0x407   : > { %v848_v14 = vpop.f32.mrf.mxu0 }
 0x408   : > { %v1075_v15 = vpack.c.bf16 %v853_v13, %v853_v13 }
 0x409   : > { %v1153_v16 = vpop.f32.mrf.mxu0 }
 0x40a   : > { %858 = vrot.lane.b32.xlu1 %v1075_v15, %s1449_s24 }
 0x452   : > { %v597_v17 = vpop.permute.xlu0 %596 }
 0x453   : > { %600 = vst.msk [vmem:[#allocation3] sm:$0xf] %vm599_vm7, %v597_v17 }
 0x46f   : > { %v728_v18 = vpop.permute.xlu1 %727 }
 0x470   : > { %731 = vst.msk [vmem:[#allocation3] sm:$0xf] %vm730_vm8, %v728_v18 }
 0x47c   : > { %v859_v0 = vpop.permute.xlu1 %858 }
 0x47d   : > { %862 = vst.msk [vmem:[#allocation3] sm:$0xf] %vm861_vm9, %v859_v0 }
 0x484   : > { %v863_v19 = vld [vmem:[#allocation3] sm:$0xf] }
 0x485   : > { %1159 = vmatmul.mubr.msk.bf16.vlgmr.msra.gmra.mxu1 %vm294_vm1, %v863_v19 }
 0x545   : > { %v924_v21 = vpop.f32.mrf.mxu1 }
 0x546   : > { %v925_v22 = vadd.f32 %v1065_v20, %v924_v21 }
 0x547   : > { %v1160_v23 = vpop.f32.mrf.mxu1 }
 0x548   : > { %930 = vst.msk [vmem:[%s268_s12] sm:$0xff] %vm294_vm1, %v925_v22 }
 0x549   : > { %v927_v24 = vpop.f32.mrf.mxu1 }
 0x54a   : > { %1372 = shalt.err (!%p1369_p9)
}
 0x54b   : > { %s1373_s17 = scalar_lea.hbm %s1698_s28, 128  ;;  %s1377_s26 = scalar_lea.hbm %s1747_s5, 256 }
 0x54c   : > { %p1374_p13 = scmp.ne.s32.totalorder %s1698_s28, %s1373_s17  ;;  %p1378_p0 = scmp.lt.s32.totalorder %s1698_s28, %s1747_s5 }
 0x54d   : > { %p1379_p4 = scmp.lt.s32.totalorder %s1377_s26, %s1373_s17 }
 0x54e   : > { %p1375_p5 = pnand %p1374_p13, %p1763_p11 }
 0x54f   : > { %p1380_p8 = por %p1379_p4, %p1378_p0 }
 0x550   : > { %p1376_p10 = pneg %p1375_p5 }
 0x552   : > { %p1381_p3 = pnand %p1380_p8, %p1376_p10 }
 0x554   : > { %1384 = shalt.err (!%p1381_p3)
}
 0x555   : > { %1172 = dma.vmem_to_hbm [thread:$0]  (%p1763_p11), %s1700_s30, 128, %s1698_s28, %s932_s7   ;;  %v1161_v25 = vpop.f32.mrf.mxu1 }
 0x556 PF: > { %s957_s11 = sand.u32 1, %s1415_s18   ;;  %p1764_p1 = scmp.ne.s32.totalorder %s1753_s25, 0 }
 0x557   : > { %p1765_p2 = scmp.ge.s32.totalorder %s1427_s21, 2  ;;  %s958_s12 = scalar_lea.sflag [#allocation6], %s957_s11 }
 0x559   : > { %p1186_p6 = pnand %p1765_p2, %p1764_p1 }
 0x55b   : > { %p1187_p12 = pneg %p1186_p6 }
 0x55d   : > { %1410 = dma.done.wait (%p1187_p12), %s958_s12, 128  }
 0x55e   : > { %1412 = vsyncadd (%p1187_p12), %s958_s12, 4294967168  ;;  %p19_p7 = scmp.ge.s32.totalorder %s1553_s15, 4   ;;  %s1766_s18 = smov %s1419_s19 }
 0x55f   : > { %s1767_s19 = smov %s1423_s20  ;;  %s1768_s20 = smov %s1569_s27 }
 0x560   : > { %s1769_s21 = smov %s1553_s15  ;;  %21 = sbr.rel (!%p19_p7) target bundleno = 6 (0x6), region = 93 }
 0x565   :  { %963 = vsyncpa [#allocation5], 1 }
 0x566   :  { %965 = vsyncpa [#allocation5 + $0x1], 1 }
 0x567   :  { %966 = vsyncpa [#allocation8], 1 }
 0x568   :  { %967 = vsyncpa [#allocation6], 1 }
 0x569   :  { %969 = vsyncpa [#allocation6 + $0x1], 1 }

</bundles_post_ra>
